<compile_context>
chip_gen: v7x
topology: tpu7x:2x2x1
jax: 0.10.0
libtpu: 0.0.40
codegen_flags: <defaults>
</compile_context>

<pallas_src>
import functools
import math

import jax
import jax.numpy as jnp
from jax import lax
from jax.experimental import pallas as pl
from jax.experimental.pallas import tpu as pltpu

_LANE = 128
_SUBLANE = 8
_MAX_BLOCK_ROWS = 512  # 512 x 128 f32 = 256 KiB per operand per grid step


def _joint_sample_kernel(param_ref, mu_ref, std_ref, mask_ref,
                         ua_ref, u1_ref, u2_ref,
                         adj_ref, w_ref, *, inv_temp, reparametrized):
    """Fused sampling of adjacency + conditional edge weights (lane-dense slab)."""
    param = param_ref[...]          # logits (reparam) or probs (non-reparam)
    mask = mask_ref[...]            # off-diagonal mask, broadcast over batch
    ua = ua_ref[...]                # uniform noise for the adjacency sample

    if reparametrized:
        # binary-Concrete / Gumbel-Softmax relaxation; single-log logistic noise
        logistic = jnp.log(ua / (1.0 - ua))
        adj = jax.nn.sigmoid((param + logistic) * jnp.float32(inv_temp))
    else:
        # hard Bernoulli sample (param already holds sigmoid(logits))
        adj = (ua < param).astype(jnp.float32)
    adj = adj * mask

    # Box-Muller standard normal for the conditional Normal weight sample
    u1 = u1_ref[...]
    u2 = u2_ref[...]
    eps = jnp.sqrt(-2.0 * jnp.log(u1)) * jnp.cos(jnp.float32(2.0 * math.pi) * u2)
    w = (mu_ref[...] + std_ref[...] * eps) * adj

    adj_ref[...] = adj
    w_ref[...] = w


def _flatten_pad(x, padded_total, rows):
    """Flatten to 1D, zero-pad, reshape to the lane-dense (rows, 128) layout."""
    flat = jnp.ravel(x)
    flat = jnp.pad(flat, (0, padded_total - flat.shape[0]))
    return flat.reshape(rows, _LANE)


def factorised_joint_forward(logits, means, log_stds, batch_size, *,
                             key=None, reparametrized=True, temp=None,
                             return_meta=False):
    """Pallas equivalent of Factorised_JointDistribution.forward."""
    if temp is None:
        temp = 1.0
    if key is None:
        key = jax.random.PRNGKey(0)

    n = logits.shape[0]
    assert logits.shape == (n, n) == means.shape == log_stds.shape
    batch_size = int(batch_size)

    # ---- batch-invariant work hoisted out of the kernel (plain XLA) ----------
    probs = jax.nn.sigmoid(logits)          # Bernoulli success probabilities
    stds = jnp.exp(log_stds)                # Normal std-devs

    row = lax.broadcasted_iota(jnp.int32, (n, n), 0)
    col = lax.broadcasted_iota(jnp.int32, (n, n), 1)
    off_diag = (row != col).astype(jnp.float32)   # no self-loops

    # ---- lane-dense flattened layout: (B*n*n) -> (rows, 128) -----------------
    total = batch_size * n * n
    rows = -(-total // _LANE)
    rows = -(-rows // _SUBLANE) * _SUBLANE
    block_rows = min(rows, _MAX_BLOCK_ROWS)
    rows = -(-rows // block_rows) * block_rows
    padded_total = rows * _LANE
    grid = (rows // block_rows,)
    slab_shape = (rows, _LANE)

    adj_param = logits if reparametrized else probs
    bshape = (batch_size, n, n)
    param_f = _flatten_pad(jnp.broadcast_to(adj_param[None], bshape), padded_total, rows)
    mu_f = _flatten_pad(jnp.broadcast_to(means[None], bshape), padded_total, rows)
    std_f = _flatten_pad(jnp.broadcast_to(stds[None], bshape), padded_total, rows)
    mask_f = _flatten_pad(jnp.broadcast_to(off_diag[None], bshape), padded_total, rows)

    # Uniform noise bits (clamped away from {0, 1} so the in-kernel log/Box-Muller
    # transforms stay finite, even in the padded tail).
    ka, k1, k2 = jax.random.split(key, 3)
    tiny = 1e-7
    u_a = jax.random.uniform(ka, slab_shape, jnp.float32, minval=tiny, maxval=1.0 - tiny)
    u_1 = jax.random.uniform(k1, slab_shape, jnp.float32, minval=tiny, maxval=1.0)
    u_2 = jax.random.uniform(k2, slab_shape, jnp.float32)

    kernel = functools.partial(_joint_sample_kernel,
                               inv_temp=float(1.0 / float(temp)),
                               reparametrized=bool(reparametrized))

    blk = pl.BlockSpec((block_rows, _LANE), lambda i: (i, 0))
    grid_spec = pltpu.PrefetchScalarGridSpec(
        num_scalar_prefetch=0,
        grid=grid,
        in_specs=[blk, blk, blk, blk, blk, blk, blk],
        out_specs=[blk, blk],
    )

    adj_f, w_f = pl.pallas_call(
        kernel,
        out_shape=(jax.ShapeDtypeStruct(slab_shape, jnp.float32),
                   jax.ShapeDtypeStruct(slab_shape, jnp.float32)),
        grid_spec=grid_spec,
        compiler_params=pltpu.CompilerParams(
            dimension_semantics=("parallel",)),
    )(param_f, mu_f, std_f, mask_f, u_a, u_1, u_2)

    adj = adj_f.reshape(-1)[:total].reshape(batch_size, n, n)
    w = w_f.reshape(-1)[:total].reshape(batch_size, n, n)

    if return_meta:
        return adj, w, probs, (means, stds)
    return adj, w


# TODO(synk): log_prob() and mode() of the original module are not implemented
# here; only the forward / _sample path is translated to a Pallas kernel.


if __name__ == "__main__":
    n_nodes = 8
    batch_size = 4

    key = jax.random.PRNGKey(0)
    k1, k2, k3, knoise = jax.random.split(key, 4)
    # Deterministic synthetic "parameters" of the sub-distributions.
    logits = jax.random.normal(k1, (n_nodes, n_nodes), dtype=jnp.float32)
    means = 0.5 * jax.random.normal(k2, (n_nodes, n_nodes), dtype=jnp.float32)
    log_stds = 0.1 * jax.random.normal(k3, (n_nodes, n_nodes), dtype=jnp.float32) - 1.0

    # Reparametrized (rsample / forward default) path.
    adj, w, probs, (mu, std) = factorised_joint_forward(
        logits, means, log_stds, batch_size,
        key=knoise, reparametrized=True, temp=0.5, return_meta=True)
    jax.block_until_ready((adj, w, probs, mu, std))

    assert adj.shape == (batch_size, n_nodes, n_nodes)
    assert w.shape == (batch_size, n_nodes, n_nodes)
    assert probs.shape == (n_nodes, n_nodes)
    assert bool(jnp.all(jnp.diagonal(adj, axis1=1, axis2=2) == 0.0))
    assert bool(jnp.all((adj >= 0.0) & (adj <= 1.0)))
    assert bool(jnp.all(jnp.isfinite(w)))

    # Non-reparametrized (sample) path: hard 0/1 adjacency, weights masked by it.
    adj_h, w_h = factorised_joint_forward(
        logits, means, log_stds, batch_size,
        key=knoise, reparametrized=False)
    jax.block_until_ready((adj_h, w_h))

    assert bool(jnp.all((adj_h == 0.0) | (adj_h == 1.0)))
    assert bool(jnp.all(jnp.diagonal(adj_h, axis1=1, axis2=2) == 0.0))
    assert bool(jnp.all(jnp.where(adj_h == 0.0, w_h == 0.0, True)))
    assert bool(jnp.all(jnp.isfinite(w_h)))

    print("KERNEL_OK")
</pallas_src>

<mosaic_0001>
module attributes {stable_mosaic.version = 11 : i64} {
  func.func @_joint_sample_kernel(%arg0: i32, %arg1: memref<8x128xf32, #tpu.memory_space<vmem>>, %arg2: memref<8x128xf32, #tpu.memory_space<vmem>>, %arg3: memref<8x128xf32, #tpu.memory_space<vmem>>, %arg4: memref<8x128xf32, #tpu.memory_space<vmem>>, %arg5: memref<8x128xf32, #tpu.memory_space<vmem>>, %arg6: memref<8x128xf32, #tpu.memory_space<vmem>>, %arg7: memref<8x128xf32, #tpu.memory_space<vmem>>, %arg8: memref<8x128xf32, #tpu.memory_space<vmem>>, %arg9: memref<8x128xf32, #tpu.memory_space<vmem>>) attributes {dimension_semantics = [#tpu.dimension_semantics<parallel>], iteration_bounds = array<i64: 1>, scalar_prefetch = 0 : i64, scratch_operands = 0 : i64, tpu.core_type = #tpu.core_type<tc>, window_params = [{transform_indices = @transform_0, window_bounds = array<i64: 8, 128>}, {transform_indices = @transform_1, window_bounds = array<i64: 8, 128>}, {transform_indices = @transform_2, window_bounds = array<i64: 8, 128>}, {transform_indices = @transform_3, window_bounds = array<i64: 8, 128>}, {transform_indices = @transform_4, window_bounds = array<i64: 8, 128>}, {transform_indices = @transform_5, window_bounds = array<i64: 8, 128>}, {transform_indices = @transform_6, window_bounds = array<i64: 8, 128>}, {transform_indices = @transform_7, window_bounds = array<i64: 8, 128>}, {transform_indices = @transform_8, window_bounds = array<i64: 8, 128>}]} {
    %c0 = arith.constant 0 : index
    %c0_0 = arith.constant 0 : index
    %0 = vector.load %arg1[%c0, %c0_0] : memref<8x128xf32, #tpu.memory_space<vmem>>, vector<8x128xf32>
    %c0_1 = arith.constant 0 : index
    %c0_2 = arith.constant 0 : index
    %1 = vector.load %arg4[%c0_1, %c0_2] : memref<8x128xf32, #tpu.memory_space<vmem>>, vector<8x128xf32>
    %c0_3 = arith.constant 0 : index
    %c0_4 = arith.constant 0 : index
    %2 = vector.load %arg5[%c0_3, %c0_4] : memref<8x128xf32, #tpu.memory_space<vmem>>, vector<8x128xf32>
    %cst = arith.constant 1.000000e+00 : f32
    %3 = vector.broadcast %cst : f32 to vector<8x128xf32>
    %4 = arith.subf %3, %2 : vector<8x128xf32>
    %5 = arith.divf %2, %4 : vector<8x128xf32>
    %6 = math.log %5 : vector<8x128xf32>
    %7 = arith.addf %0, %6 : vector<8x128xf32>
    %cst_5 = arith.constant 2.000000e+00 : f32
    %8 = vector.broadcast %cst_5 : f32 to vector<8x128xf32>
    %9 = arith.mulf %7, %8 : vector<8x128xf32>
    %10 = arith.negf %9 : vector<8x128xf32>
    %11 = math.exp %10 : vector<8x128xf32>
    %cst_6 = arith.constant 1.000000e+00 : f32
    %12 = vector.broadcast %cst_6 : f32 to vector<8x128xf32>
    %13 = arith.addf %12, %11 : vector<8x128xf32>
    %14 = arith.divf %12, %13 : vector<8x128xf32>
    %15 = arith.mulf %14, %1 : vector<8x128xf32>
    %c0_7 = arith.constant 0 : index
    %c0_8 = arith.constant 0 : index
    %16 = vector.load %arg6[%c0_7, %c0_8] : memref<8x128xf32, #tpu.memory_space<vmem>>, vector<8x128xf32>
    %c0_9 = arith.constant 0 : index
    %c0_10 = arith.constant 0 : index
    %17 = vector.load %arg7[%c0_9, %c0_10] : memref<8x128xf32, #tpu.memory_space<vmem>>, vector<8x128xf32>
    %18 = math.log %16 : vector<8x128xf32>
    %cst_11 = arith.constant -2.000000e+00 : f32
    %19 = vector.broadcast %cst_11 : f32 to vector<8x128xf32>
    %20 = arith.mulf %19, %18 : vector<8x128xf32>
    %21 = math.sqrt %20 : vector<8x128xf32>
    %cst_12 = arith.constant 6.28318548 : f32
    %22 = vector.broadcast %cst_12 : f32 to vector<8x128xf32>
    %23 = arith.mulf %22, %17 : vector<8x128xf32>
    %24 = math.cos %23 : vector<8x128xf32>
    %25 = arith.mulf %21, %24 : vector<8x128xf32>
    %c0_13 = arith.constant 0 : index
    %c0_14 = arith.constant 0 : index
    %26 = vector.load %arg2[%c0_13, %c0_14] : memref<8x128xf32, #tpu.memory_space<vmem>>, vector<8x128xf32>
    %c0_15 = arith.constant 0 : index
    %c0_16 = arith.constant 0 : index
    %27 = vector.load %arg3[%c0_15, %c0_16] : memref<8x128xf32, #tpu.memory_space<vmem>>, vector<8x128xf32>
    %28 = arith.mulf %27, %25 : vector<8x128xf32>
    %29 = arith.addf %26, %28 : vector<8x128xf32>
    %30 = arith.mulf %29, %15 : vector<8x128xf32>
    %c0_17 = arith.constant 0 : index
    %c0_18 = arith.constant 0 : index
    %31 = vector.load %arg8[%c0_17, %c0_18] : memref<8x128xf32, #tpu.memory_space<vmem>>, vector<8x128xf32>
    tpu.vector_store %arg8[%c0_17, %c0_18], %15 {strides = array<i32>} : memref<8x128xf32, #tpu.memory_space<vmem>>, vector<8x128xf32>,
    %c0_19 = arith.constant 0 : index
    %c0_20 = arith.constant 0 : index
    %32 = vector.load %arg9[%c0_19, %c0_20] : memref<8x128xf32, #tpu.memory_space<vmem>>, vector<8x128xf32>
    tpu.vector_store %arg9[%c0_19, %c0_20], %30 {strides = array<i32>} : memref<8x128xf32, #tpu.memory_space<vmem>>, vector<8x128xf32>,
    return
  }
  func.func @transform_0(%arg0: i32) -> (i32, i32) {
    %c0_i32 = arith.constant 0 : i32
    %c0_i32_0 = arith.constant 0 : i32
    return %arg0, %c0_i32 : i32, i32
  }
  func.func @transform_1(%arg0: i32) -> (i32, i32) {
    %c0_i32 = arith.constant 0 : i32
    %c0_i32_0 = arith.constant 0 : i32
    return %arg0, %c0_i32 : i32, i32
  }
  func.func @transform_2(%arg0: i32) -> (i32, i32) {
    %c0_i32 = arith.constant 0 : i32
    %c0_i32_0 = arith.constant 0 : i32
    return %arg0, %c0_i32 : i32, i32
  }
  func.func @transform_3(%arg0: i32) -> (i32, i32) {
    %c0_i32 = arith.constant 0 : i32
    %c0_i32_0 = arith.constant 0 : i32
    return %arg0, %c0_i32 : i32, i32
  }
  func.func @transform_4(%arg0: i32) -> (i32, i32) {
    %c0_i32 = arith.constant 0 : i32
    %c0_i32_0 = arith.constant 0 : i32
    return %arg0, %c0_i32 : i32, i32
  }
  func.func @transform_5(%arg0: i32) -> (i32, i32) {
    %c0_i32 = arith.constant 0 : i32
    %c0_i32_0 = arith.constant 0 : i32
    return %arg0, %c0_i32 : i32, i32
  }
  func.func @transform_6(%arg0: i32) -> (i32, i32) {
    %c0_i32 = arith.constant 0 : i32
    %c0_i32_0 = arith.constant 0 : i32
    return %arg0, %c0_i32 : i32, i32
  }
  func.func @transform_7(%arg0: i32) -> (i32, i32) {
    %c0_i32 = arith.constant 0 : i32
    %c0_i32_0 = arith.constant 0 : i32
    return %arg0, %c0_i32 : i32, i32
  }
  func.func @transform_8(%arg0: i32) -> (i32, i32) {
    %c0_i32 = arith.constant 0 : i32
    %c0_i32_0 = arith.constant 0 : i32
    return %arg0, %c0_i32 : i32, i32
  }
}

</mosaic_0001>

<bundles_post_ra>
// kernel: tpu_custom_call.1
= control target key start
LH: loop header
LB: loop body
LE: loop exit
PB: predicated region body
PF: predicated region fallthrough
CT: control target
= control target key end

     0   :  { %14 = vsyncpa [#allocation3], 0  ;;  %s631_s0 = inlined_call_operand.hbm [shape: f32[8,128], index: 0, kind: input, shape index: {}]   ;;  %s632_s1 = inlined_call_operand.hbm [shape: f32[8,128], index: 1, kind: input, shape index: {}]   ;;  %s633_s2 = inlined_call_operand.hbm [shape: f32[8,128], index: 2, kind: input, shape index: {}]   ;;  %s634_s3 = inlined_call_operand.vmem [shape: f32[8,128], index: 3, kind: input, shape index: {}]   ;;  %s635_s4 = inlined_call_operand.hbm [shape: f32[8,128], index: 4, kind: input, shape index: {}]   ;;  %s636_s5 = inlined_call_operand.vmem [shape: f32[8,128], index: 5, kind: input, shape index: {}]   ;;  %s637_s6 = inlined_call_operand.hbm [shape: f32[8,128], index: 6, kind: input, shape index: {}]   ;;  %s638_s7 = inlined_call_operand.hbm [shape: f32[8,128], index: 7, kind: output, shape index: {0}]   ;;  %s639_s8 = inlined_call_operand.hbm [shape: f32[8,128], index: 8, kind: output, shape index: {1}]  }
   0x1   :  { %15 = vsyncpa [#allocation6], 0 }
   0x2   :  { %16 = vsyncpa [#allocation9], 0 }
   0x3   :  { %17 = vsyncpa [#allocation4], 0 }
   0x4   :  { %18 = vsyncpa [#allocation13], 0  ;;  %s462_s27 = smov [#allocation5]   ;;  %s463_s29 = smov [#allocation8]  }
   0x5   :  { %s35_s28 = sshll.u32 %s462_s27, 4  ;;  %s57_s30 = sshll.u32 %s463_s29, 4  ;;  %s36_s28 = int_to_ptr.vmem [resolvable:$true] %s35_s28  ;;  %s58_s30 = int_to_ptr.vmem [resolvable:$true] %s57_s30 }
   0x6   :  { %s298_s11 = scalar_lea.hbm %s632_s1, 128 }
   0x7   :  { %p299_p0 = scmp.ne.s32.totalorder %s632_s1, %s298_s11  ;;  %p302_p1 = scmp.lt.u32.totalorder %s298_s11, %s632_s1 }
   0x9   :  { %p304_p2 = pnand %p302_p1, %p299_p0 }
   0xb   :  { %307 = shalt.err (!%p304_p2)
}
   0xc   :  { %s308_s16 = scalar_lea.vmem %s36_s28, 128  ;;  %p313_p4 = scmp.lt.s32.totalorder %s36_s28, %s36_s28 }
   0xd   :  { %p309_p3 = scmp.ne.s32.totalorder %s36_s28, %s308_s16  ;;  %p314_p5 = scmp.lt.s32.totalorder %s308_s16, %s308_s16 }
   0xf   :  { %p315_p6 = por %p314_p5, %p313_p4 }
  0x11   :  { %p316_p7 = pnand %p315_p6, %p309_p3 }
  0x13   :  { %319 = shalt.err (!%p316_p7)
}
  0x14   :  { %38 = dma.hbm_to_vmem [thread:$0]  %s632_s1, 128, %s36_s28, [#allocation6]  }
  0x15   :  { %s320_s21 = scalar_lea.hbm %s635_s4, 128 }
  0x16   :  { %p321_p8 = scmp.ne.s32.totalorder %s635_s4, %s320_s21  ;;  %p324_p9 = scmp.lt.u32.totalorder %s320_s21, %s635_s4 }
  0x18   :  { %p326_p10 = pnand %p324_p9, %p321_p8 }
  0x1a   :  { %329 = shalt.err (!%p326_p10)
}
  0x1b   :  { %s330_s26 = scalar_lea.vmem %s58_s30, 128  ;;  %p335_p12 = scmp.lt.s32.totalorder %s58_s30, %s58_s30 }
  0x1c   :  { %p331_p11 = scmp.ne.s32.totalorder %s58_s30, %s330_s26  ;;  %p336_p13 = scmp.lt.s32.totalorder %s330_s26, %s330_s26 }
  0x1e   :  { %p337_p0 = por %p336_p13, %p335_p12 }
  0x20   :  { %p338_p1 = pnand %p337_p0, %p331_p11 }
  0x22   :  { %341 = shalt.err (!%p338_p1)
}
  0x23   :  { %60 = dma.hbm_to_vmem [thread:$0]  %s635_s4, 128, %s58_s30, [#allocation9]  }
  0x24   :  { %s464_s28 = smov [#allocation2]   ;;  %s465_s9 = smov [#allocation7]  }
  0x25   :  { %s25_s29 = sshll.u32 %s464_s28, 4  ;;  %s45_s10 = sshll.u32 %s465_s9, 4  ;;  %s26_s29 = int_to_ptr.vmem [resolvable:$true] %s25_s29  ;;  %s46_s10 = int_to_ptr.vmem [resolvable:$true] %s45_s10 }
  0x26   :  { %s342_s13 = scalar_lea.hbm %s631_s0, 128 }
  0x27   :  { %p343_p2 = scmp.ne.s32.totalorder %s631_s0, %s342_s13  ;;  %p346_p3 = scmp.lt.u32.totalorder %s342_s13, %s631_s0 }
  0x29   :  { %p348_p4 = pnand %p346_p3, %p343_p2 }
  0x2b   :  { %351 = shalt.err (!%p348_p4)
}
  0x2c   :  { %s352_s4 = scalar_lea.vmem %s26_s29, 128  ;;  %p357_p6 = scmp.lt.s32.totalorder %s26_s29, %s26_s29 }
  0x2d   :  { %p353_p5 = scmp.ne.s32.totalorder %s26_s29, %s352_s4  ;;  %p358_p7 = scmp.lt.s32.totalorder %s352_s4, %s352_s4 }
  0x2f   :  { %p359_p8 = por %p358_p7, %p357_p6 }
  0x31   :  { %p360_p9 = pnand %p359_p8, %p353_p5 }
  0x33   :  { %363 = shalt.err (!%p360_p9)
}
  0x34   :  { %28 = dma.hbm_to_vmem [thread:$0]  %s631_s0, 128, %s26_s29, [#allocation3]  }
  0x35   :  { %s364_s21 = scalar_lea.hbm %s633_s2, 128 }
  0x36   :  { %p365_p10 = scmp.ne.s32.totalorder %s633_s2, %s364_s21  ;;  %p368_p11 = scmp.lt.u32.totalorder %s364_s21, %s633_s2 }
  0x38   :  { %p370_p12 = pnand %p368_p11, %p365_p10 }
  0x3a   :  { %373 = shalt.err (!%p370_p12)
}
  0x3b   :  { %s374_s26 = scalar_lea.vmem %s46_s10, 128  ;;  %p379_p0 = scmp.lt.s32.totalorder %s46_s10, %s46_s10 }
  0x3c   :  { %p375_p13 = scmp.ne.s32.totalorder %s46_s10, %s374_s26  ;;  %p380_p1 = scmp.lt.s32.totalorder %s374_s26, %s374_s26 }
  0x3e   :  { %p381_p2 = por %p380_p1, %p379_p0 }
  0x40   :  { %p382_p3 = pnand %p381_p2, %p375_p13 }
  0x42   :  { %385 = shalt.err (!%p382_p3)
}
  0x43   :  { %48 = dma.hbm_to_vmem [thread:$0]  %s633_s2, 128, %s46_s10, [#allocation6]  }
  0x44   :  { %s466_s27 = smov [#allocation10]   ;;  %s386_s11 = scalar_lea.hbm %s637_s6, 128 }
  0x45   :  { %s69_s28 = sshll.u32 %s466_s27, 4  ;;  %p387_p4 = scmp.ne.s32.totalorder %s637_s6, %s386_s11  ;;  %s70_s28 = int_to_ptr.vmem [resolvable:$true] %s69_s28 }
  0x46   :  { %p390_p5 = scmp.lt.u32.totalorder %s386_s11, %s637_s6 }
  0x48   :  { %p392_p6 = pnand %p390_p5, %p387_p4 }
  0x4a   :  { %395 = shalt.err (!%p392_p6)
}
  0x4b   :  { %s396_s16 = scalar_lea.vmem %s70_s28, 128  ;;  %p401_p8 = scmp.lt.s32.totalorder %s70_s28, %s70_s28 }
  0x4c   :  { %p397_p7 = scmp.ne.s32.totalorder %s70_s28, %s396_s16  ;;  %p402_p9 = scmp.lt.s32.totalorder %s396_s16, %s396_s16 }
  0x4e   :  { %p403_p10 = por %p402_p9, %p401_p8 }
  0x50   :  { %p404_p11 = pnand %p403_p10, %p397_p7 }
  0x52   :  { %407 = shalt.err (!%p404_p11)
}
  0x53   :  { %72 = dma.hbm_to_vmem [thread:$0]  %s637_s6, 128, %s70_s28, [#allocation9]  }
  0x54   :  { %452 = dma.done.wait [#allocation3], 128  }
  0x55   :  { %453 = vsyncadd [#allocation3], 4294967168 }
  0x56   :  { %454 = dma.done.wait [#allocation6], 256  }
  0x57   :  { %455 = vsyncadd [#allocation6], 4294967040 }
  0x58   :  { %456 = dma.done.wait [#allocation9], 256  }
  0x59   :  { %457 = vsyncadd [#allocation9], 4294967040  ;;  %v90_v0 = vld [vmem:[#allocation8] sm:$0xff]  ;;  %v106_v2 = vld [vmem:[#allocation10] sm:$0xff]  ;;  %v467_v16 = vmov 683565275  }
  0x5a   :  { %v91_v1 = vsub.f32 1.0, %v90_v0  ;;  %v580_v3 = vmul.f32 6.2831855, %v106_v2  ;;  %v468_v18 = vmov 2475754826   ;;  %v88_v51 = vld [vmem:[#allocation2] sm:$0xff] }
  0x5b   :  { %v469_v23 = vmov 2131351028   ;;  %v470_v26 = vmov 2102212464   ;;  %v471_v29 = vmov 920167782  }
  0x5c   :  { %282 = vrcp.f32 %v91_v1  ;;  %v121_v4 = vand.u32 2139095040, %v580_v3  ;;  %v118_v7 = vand.u32 2147483647, %v580_v3  ;;  %v472_v34 = vmov 1326507024   ;;  %s473_s30 = smov [#allocation11]  }
  0x5d   :  { %s235_s18 = sshll.u32 %s473_s30, 4  ;;  %s236_s18 = int_to_ptr.vmem [resolvable:$true] %s235_s18 }
  0x5e   :  { %v122_v5 = vshrl.u32 %v121_v4, 23  ;;  %v125_v10 = vand.u32 8388607, %v118_v7  ;;  %s408_s19 = scalar_lea.vmem %s236_s18, 128  ;;  %p413_p13 = scmp.lt.s32.totalorder %s236_s18, %s236_s18 }
  0x5f   :  { %p409_p12 = scmp.ne.s32.totalorder %s236_s18, %s408_s19  ;;  %p414_p0 = scmp.lt.s32.totalorder %s408_s19, %s408_s19 }
  0x60   :  { %v261_v6 = vadd.s32 4294967169, %v122_v5  ;;  %v126_v20 = vor.u32 8388608, %v125_v10  ;;  %v105_v5 = vld [vmem:[%s636_s5] sm:$0xff] }
  0x61   :  { %p415_p1 = por %p414_p0, %p413_p13 }
  0x62   :  { %v128_v8 = vadd.s32 1, %v261_v6  ;;  %v166_v38 = vshll.u32 %v126_v20, 8 }
  0x63   :  { %p416_p2 = pnand %p415_p1, %p409_p12 }
  0x64   :  { %vm129_vm0 = vcmp.gt.s32.totalorder %v128_v8, 0 }
  0x65   :  { %v130_v11 = vsel %vm129_vm0, %v128_v8, 0 }
  0x66   :  { %v283_v9 = vpop.eup %282  ;;  %v132_v13 = vand.u32 31, %v130_v11  ;;  %v131_v14 = vshrl.u32 %v130_v11, 5 }
  0x67   :  { %v93_v12 = vmul.f32 %v283_v9, %v90_v0 }
  0x68   :  { %v133_v15 = vsub.s32 32, %v132_v13  ;;  %v135_v17 = vshll.u32 %v467_v16, %v132_v13  ;;  %v138_v19 = vshll.u32 %v468_v18, %v132_v13  ;;  %v141_v25 = vshll.u32 %v469_v23, %v132_v13 }
  0x69   :  { %284 = vlog2.f32 %v93_v12  ;;  %v144_v28 = vshll.u32 %v470_v26, %v132_v13  ;;  %v147_v31 = vshll.u32 %v471_v29, %v132_v13  ;;  %vm150_vm1 = vcmp.lt.s32.totalorder %v131_v14, 1 }
  0x6a   :  { %v134_v21 = vshrl.u32 %v467_v16, %v133_v15  ;;  %v136_v22 = vshrl.u32 %v468_v18, %v133_v15  ;;  %v139_v24 = vshrl.u32 %v469_v23, %v133_v15  ;;  %v142_v27 = vshrl.u32 %v470_v26, %v133_v15 }
  0x6b   :  { %v145_v30 = vshrl.u32 %v471_v29, %v133_v15  ;;  %v148_v35 = vshrl.u32 %v472_v34, %v133_v15  ;;  %vm152_vm2 = vcmp.lt.s32.totalorder %v131_v14, 3  ;;  %vm151_vm3 = vcmp.lt.s32.totalorder %v131_v14, 2 }
  0x6c   :  { %v137_v32 = vor.u32 %v136_v22, %v135_v17  ;;  %v140_v33 = vor.u32 %v139_v24, %v138_v19  ;;  %v143_v36 = vor.u32 %v142_v27, %v141_v25  ;;  %vm153_vm4 = vcmp.lt.s32.totalorder %v131_v14, 4  ;;  %v89_v24 = vld [vmem:[%s634_s3] sm:$0xff] }
  0x6d   :  { %v146_v37 = vor.u32 %v145_v30, %v144_v28  ;;  %v149_v39 = vor.u32 %v148_v35, %v147_v31 }
  0x6e   :  { %v158_v40 = vsel %vm150_vm1, %v137_v32, %v140_v33  ;;  %v154_v41 = vsel %vm150_vm1, %v134_v21, %v137_v32  ;;  %v155_v42 = vsel %vm153_vm4, %v143_v36, 2102212464  ;;  %v162_v44 = vsel %vm150_vm1, %v140_v33, %v143_v36 }
  0x6f   :  { %v159_v43 = vsel %vm153_vm4, %v146_v37, 920167782  ;;  %v156_v45 = vsel %vm152_vm2, %v140_v33, %v155_v42  ;;  %v163_v47 = vsel %vm153_vm4, %v149_v39, 1326507024 }
  0x70   :  { %v160_v46 = vsel %vm152_vm2, %v143_v36, %v159_v43  ;;  %v164_v49 = vsel %vm152_vm2, %v146_v37, %v163_v47  ;;  %v157_v52 = vsel %vm151_vm3, %v154_v41, %v156_v45 }
  0x71   :  { %v161_v48 = vsel %vm151_vm3, %v158_v40, %v160_v46  ;;  %v165_v53 = vsel %vm151_vm3, %v162_v44, %v164_v49  ;;  %v173_v60 = vmul.u32 %v166_v38, %v157_v52 }
  0x72   :  { %v586_v54 = vmul.u32.u64.low %v166_v38, %v161_v48  ;;  %v587_v55 = vmul.u32.u64.high %v166_v38, %v161_v48, %v586_v54  ;;  %v589_v57 = vmul.u32.u64.low %v166_v38, %v165_v53  ;;  %v590_v58 = vmul.u32.u64.high %v166_v38, %v165_v53, %v589_v57 }
  0x73   :  { %v285_v50 = vpop.eup %284 }
  0x74   :  { %v95_v56 = vmul.f32 0.6931472, %v285_v50  ;;  %v176_v61 = vadd.s32 1, %v587_v55  ;;  %vm175_vm5 = vc.u32 %v590_v58, %v586_v54  ;;  %v174_v15 = vadd.s32 %v586_v54, %v590_v58 }
  0x76   :  { %v96_v59 = vadd.f32 %v95_v56, %v88_v51  ;;  %v177_v63 = vsel %vm175_vm5, %v176_v61, %v587_v55 }
  0x77   :  { %v178_v1 = vadd.s32 %v177_v63, %v173_v60 }
  0x78   :  { %v260_v62 = vmul.f32 -2.0, %v96_v59 }
  0x79   :  { %v179_v2 = vadd.s32 536870912, %v178_v1 }
  0x7a   :  { %v99_v0 = vmul.f32 1.442695, %v260_v62 }
  0x7b   :  { %v180_v4 = vshrl.u32 %v179_v2, 30 }
  0x7c   :  { %286 = vpow2.f32 %v99_v0 }
  0x7d   :  { %v181_v6 = vshll.u32 %v180_v4, 30  ;;  %288 = vlog2.f32 %v105_v5 }
  0x7f   :  { %v182_v8 = vsub.s32 %v178_v1, %v181_v6 }
  0x81   :  { %v184_v9 = vsub.s32 0, %v182_v8 }
  0x83   :  { %v262_v11 = vmin.u32 %v184_v9, %v182_v8 }
  0x85   :  { %v186_v13 = vclz %v262_v11 }
  0x86   :  { %v287_v10 = vpop.eup %286 }
  0x87   :  { %v101_v12 = vadd.f32 1.0, %v287_v10  ;;  %v263_v14 = vadd.s32 4294967294, %v186_v13  ;;  %v289_v16 = vpop.eup %288 }
  0x88   :  { %v108_v21 = vmul.f32 0.6931472, %v289_v16 }
  0x89   :  { %290 = vrcp.f32 %v101_v12  ;;  %vm264_vm6 = vcmp.lt.s32.totalorder %v263_v14, 0 }
  0x8a   :  { %v189_v17 = vsel %vm264_vm6, 0, %v263_v14  ;;  %v109_v29 = vmul.f32 -2.0, %v108_v21 }
  0x8b   :  { %v190_v18 = vsub.s32 32, %v189_v17  ;;  %v191_v19 = vshll.u32 %v182_v8, %v189_v17  ;;  %v194_v20 = vsub.s32 4294967266, %v189_v17 }
  0x8d   :  { %v192_v22 = vshrl.u32 %v174_v15, %v190_v18  ;;  %v195_v23 = vadd.s32 127, %v194_v20 }
  0x8f   :  { %v193_v25 = vor.u32 %v192_v22, %v191_v19  ;;  %v196_v26 = vshll.u32 %v195_v23, 23 }
  0x91   :  { %v197_v30 = vor.u32 4788187, %v196_v26  ;;  %v200_v31 = vcvt.s32.f32 %v193_v25 }
  0x93   :  { %v291_v27 = vpop.eup %290  ;;  %v198_v32 = vand.u32 2147483647, %v197_v30 }
  0x94   :  { %v104_v28 = vmul.f32 %v291_v27, %v89_v24 }
  0x96   :  { %227 = vst [vmem:[#allocation11] sm:$0xff] %v104_v28 }
  0x97   :  { %419 = shalt.err (!%p416_p2)
}
  0x98   :  { %s420_s21 = scalar_lea.hbm %s638_s7, 128 }
  0x99   :  { %p421_p3 = scmp.ne.s32.totalorder %s638_s7, %s420_s21  ;;  %p424_p4 = scmp.lt.u32.totalorder %s420_s21, %s638_s7 }
  0x9b   :  { %p426_p5 = pnand %p424_p4, %p421_p3 }
  0x9d   :  { %429 = shalt.err (!%p426_p5)
}
  0x9e   :  { %238 = dma.vmem_to_hbm [thread:$0]  %s236_s18, 128, %s638_s7, [#allocation4]   ;;  %292 = vrsqrt.f32 %v109_v29  ;;  %v201_v33 = vmul.f32 %v200_v31, %v198_v32  ;;  %vm120_vm7 = vcmp.lt.s32.totalorder %v580_v3, 0  ;;  %vm119_vm8 = vcmp.le.f32.partialorder %v118_v7, 0.7853982  ;;  %v223_v53 = vld [vmem:[#allocation7] sm:$0xff] }
  0x9f   :  { %v204_v35 = vsub.s32 4, %v180_v4  ;;  %vm112_vm9 = vcmp.eq.f32.partialorder %v109_v29, inf  ;;  %v115_v44 = vand.u32 2147483648, %v109_v29  ;;  %vm114_vm11 = vcmp.eq.f32.partialorder %v109_v29, 0.0  ;;  %v222_v55 = vld [vmem:[#allocation5] sm:$0xff]  ;;  %s474_s7 = smov [#allocation12]  }
  0xa0   :  { %v202_v34 = vxor.u32 2147483648, %v201_v33  ;;  %vm210_vm14 = vweird.f32 %v580_v3  ;;  %s245_s1 = sshll.u32 %s474_s7, 4  ;;  %s246_s1 = int_to_ptr.vmem [resolvable:$true] %s245_s1 }
  0xa1   :  { %v205_v38 = vsel %vm120_vm7, %v204_v35, %v180_v4  ;;  %s430_s27 = scalar_lea.vmem %s246_s1, 128  ;;  %p435_p7 = scmp.lt.s32.totalorder %s246_s1, %s246_s1 }
  0xa2   :  { %v203_v36 = vsel %vm120_vm7, %v202_v34, %v201_v33  ;;  %v207_v39 = vsel %vm119_vm8, 0, %v205_v38  ;;  %p431_p6 = scmp.ne.s32.totalorder %s246_s1, %s430_s27  ;;  %p436_p8 = scmp.lt.s32.totalorder %s430_s27, %s430_s27 }
  0xa3   :  { %v206_v37 = vsel %vm119_vm8, %v580_v3, %v203_v36  ;;  %v211_v41 = vand.u32 3, %v207_v39 }
  0xa4   :  { %294 = vcosq.f32 %v206_v37  ;;  %p437_p9 = por %p436_p8, %p435_p7 }
  0xa5   :  { %296 = vsinq.f32 %v206_v37  ;;  %vm216_vm10 = vcmp.eq.s32.totalorder %v211_v41, 2  ;;  %vm213_vm12 = vcmp.eq.s32.totalorder %v211_v41, 0  ;;  %vm212_vm13 = vcmp.lt.s32.totalorder %v211_v41, 2 }
  0xa6   :  { %p438_p10 = pnand %p437_p9, %p431_p6 }
  0xa8   :  { %v293_v40 = vpop.eup %292 }
  0xa9   :  { %v111_v42 = vmul.f32 %v293_v40, %v109_v29 }
  0xab   :  { %v113_v46 = vsel %vm112_vm9, %v109_v29, %v111_v42 }
  0xac   :  { %v116_v49 = vsel %vm114_vm11, %v115_v44, %v113_v46 }
  0xae   :  { %v295_v43 = vpop.eup %294 }
  0xaf   :  { %v297_v45 = vpop.eup %296  ;;  %v217_v7 = vxor.u32 2147483648, %v295_v43 }
  0xb0   :  { %v214_v47 = vxor.u32 2147483648, %v297_v45 }
  0xb1   :  { %v218_v48 = vsel %vm216_vm10, %v217_v7, %v297_v45 }
  0xb2   :  { %v215_v50 = vsel %vm213_vm12, %v295_v43, %v214_v47 }
  0xb3   :  { %v219_v51 = vsel %vm212_vm13, %v215_v50, %v218_v48 }
  0xb4   :  { %v220_v52 = vsel %vm210_vm14, nan, %v219_v51 }
  0xb5   :  { %v221_v54 = vmul.f32 %v220_v52, %v116_v49 }
  0xb7   :  { %v224_v56 = vmul.f32 %v223_v53, %v221_v54 }
  0xb9   :  { %v225_v57 = vadd.f32 %v224_v56, %v222_v55 }
  0xbb   :  { %v226_v58 = vmul.f32 %v225_v57, %v104_v28 }
  0xbd   :  { %228 = vst [vmem:[#allocation12] sm:$0xff] %v226_v58 }
  0xbe   :  { %441 = shalt.err (!%p438_p10)
}
  0xbf   :  { %s442_s9 = scalar_lea.hbm %s639_s8, 128 }
  0xc0   :  { %p443_p11 = scmp.ne.s32.totalorder %s639_s8, %s442_s9  ;;  %p446_p12 = scmp.lt.u32.totalorder %s442_s9, %s639_s8 }
  0xc2   :  { %p448_p13 = pnand %p446_p12, %p443_p11 }
  0xc4   :  { %451 = shalt.err (!%p448_p13)
}
  0xc5   :  { %248 = dma.vmem_to_hbm [thread:$0]  %s246_s1, 128, %s639_s8, [#allocation13]  }
  0xc6   :  { %458 = dma.done.wait [#allocation4], 128  }
  0xc7   :  { %459 = vsyncadd [#allocation4], 4294967168 }
  0xc8   :  { %460 = dma.done.wait [#allocation13], 128  }
  0xc9   :  { %461 = vsyncadd [#allocation13], 4294967168 }
  0xca   :  { %255 = vsyncpa [#allocation3], 1 }
  0xcb   :  { %256 = vsyncpa [#allocation6], 1 }
  0xcc   :  { %257 = vsyncpa [#allocation9], 1 }
  0xcd   :  { %258 = vsyncpa [#allocation4], 1 }
  0xce   :  { %259 = vsyncpa [#allocation13], 1 }

</bundles_post_ra>
